<compile_context>
chip_gen: v7x
topology: tpu7x:2x2x1
jax: 0.10.0
libtpu: 0.0.40
codegen_flags: <defaults>
</compile_context>

<pallas_src>
import jax
import jax.numpy as jnp
from jax.experimental import pallas as pl
from jax.experimental.pallas import tpu as pltpu


def _round_up(x, m):
    return (x + m - 1) // m * m


def autoencoder_kernel(x_ref,
                       w1_ref, b1_ref,     # encoder fc1: input_dim -> 128
                       w23_ref, b23_ref,   # fused enc.fc2 @ dec.fc1: 128 -> 128
                       w4_ref, b4_ref,     # decoder fc2: 128 -> input_dim
                       o_ref):
    # Raw f32 input from HBM; cast to bf16 in-register for the MXU.
    x = x_ref[...].astype(jnp.bfloat16)

    # Layer 1 + ReLU
    h = jnp.dot(x, w1_ref[...], preferred_element_type=jnp.float32) + b1_ref[...]
    h = jnp.maximum(h, 0.0).astype(jnp.bfloat16)

    # Fused layers 2+3 (no nonlinearity between them in the module) + ReLU
    h2 = jnp.dot(h, w23_ref[...], preferred_element_type=jnp.float32) + b23_ref[...]
    h2 = jnp.maximum(h2, 0.0).astype(jnp.bfloat16)

    # Layer 4
    out = jnp.dot(h2, w4_ref[...], preferred_element_type=jnp.float32) + b4_ref[...]
    o_ref[...] = out.astype(o_ref.dtype)


def prepare_params(params, compute_dtype=jnp.bfloat16):
    """One-time parameter prep, hoisted out of the per-call forward path.

    params: dict of (w, b) pairs with w stored [in_features, out_features]
    (i.e. transposed from PyTorch's [out, in] storage).
    """
    (w1, b1), (w2, b2), (w3, b3), (w4, b4) = (
        params["enc_fc1"], params["enc_fc2"], params["dec_fc1"], params["dec_fc2"])
    # Fold enc.fc2 into dec.fc1 in f32 (valid because forward() only returns
    # `decoded`; skip this if the latent ever needs to be emitted).
    w2f, w3f = w2.astype(jnp.float32), w3.astype(jnp.float32)
    w23 = w2f @ w3f
    b23 = b2.astype(jnp.float32) @ w3f + b3.astype(jnp.float32)
    return {
        "w1": w1.astype(compute_dtype),
        "b1": b1.reshape(1, -1).astype(jnp.float32),
        "w23": w23.astype(compute_dtype),
        "b23": b23.reshape(1, -1).astype(jnp.float32),
        "w4": w4.astype(compute_dtype),
        "b4": b4.reshape(1, -1).astype(jnp.float32),
    }


def dist_autoencoder_forward(x, prepped, *, max_batch_tile=512):
    """x: [B, input_dim] float32. prepped: output of prepare_params()."""
    B, D = x.shape
    w1, b1 = prepped["w1"], prepped["b1"]
    w23, b23 = prepped["w23"], prepped["b23"]
    w4, b4 = prepped["w4"], prepped["b4"]
    H = w1.shape[1]  # 128 in the module

    # Batch tiling: one big tile for small batches (grid=(1,)); for large
    # batches, 512-row tiles (multiple of 16) so megacore/parallel sharding
    # and the HBM roofline both kick in.
    if B <= max_batch_tile:
        bt, Bp = B, B
    else:
        bt = max_batch_tile
        Bp = _round_up(B, bt)

    xp = x if Bp == B else jnp.pad(x, ((0, Bp - B), (0, 0)))

    full = lambda i: (0, 0)  # weights/biases resident for every grid step

    flops = 2 * Bp * (D * H + H * H + H * D)
    bytes_accessed = (
        Bp * D * 4                      # f32 input read
        + Bp * D * 4                    # f32 output write
        + sum(a.size * a.dtype.itemsize for a in (w1, b1, w23, b23, w4, b4)))

    out = pl.pallas_call(
        autoencoder_kernel,
        out_shape=jax.ShapeDtypeStruct((Bp, D), jnp.float32),
        grid=(Bp // bt,),
        in_specs=[
            pl.BlockSpec((bt, D), lambda i: (i, 0)),
            pl.BlockSpec(w1.shape, full), pl.BlockSpec(b1.shape, full),
            pl.BlockSpec(w23.shape, full), pl.BlockSpec(b23.shape, full),
            pl.BlockSpec(w4.shape, full), pl.BlockSpec(b4.shape, full),
        ],
        out_specs=pl.BlockSpec((bt, D), lambda i: (i, 0)),
        compiler_params=pltpu.CompilerParams(
            dimension_semantics=("parallel",),
            vmem_limit_bytes=32 * 1024 * 1024),
        cost_estimate=pl.CostEstimate(
            flops=flops, transcendentals=0, bytes_accessed=bytes_accessed),
    )(xp, w1, b1, w23, b23, w4, b4)

    return out if Bp == B else out[:B]


def init_linear(key, fan_in, fan_out):
    """Deterministic init mimicking nn.Linear's U(-1/sqrt(fan_in), 1/sqrt(fan_in)).
    Weight returned as [in, out] (transposed vs. PyTorch storage)."""
    kw, kb = jax.random.split(key)
    bound = 1.0 / jnp.sqrt(jnp.float32(fan_in))
    w = jax.random.uniform(kw, (fan_in, fan_out), jnp.float32, -bound, bound)
    b = jax.random.uniform(kb, (fan_out,), jnp.float32, -bound, bound)
    return w, b


def reference_forward(x, params):
    """Pure-JAX f32 reference of the original (un-fused) 4-layer module."""
    (w1, b1), (w2, b2), (w3, b3), (w4, b4) = (
        params["enc_fc1"], params["enc_fc2"], params["dec_fc1"], params["dec_fc2"])
    h = jax.nn.relu(x @ w1 + b1)
    z = h @ w2 + b2
    h2 = jax.nn.relu(z @ w3 + b3)
    return h2 @ w4 + b4


if __name__ == "__main__":
    # Small shapes consistent with DistAutoEncoder(latent_dim, input_dim, workers):
    # the module hard-codes its hidden width to 128.
    batch, input_dim, latent_dim, hidden = 16, 64, 32, 128

    key = jax.random.PRNGKey(0)
    kx, k1, k2, k3, k4 = jax.random.split(key, 5)

    x = jax.random.normal(kx, (batch, input_dim), jnp.float32)
    params = {
        "enc_fc1": init_linear(k1, input_dim, hidden),
        "enc_fc2": init_linear(k2, hidden, latent_dim),
        "dec_fc1": init_linear(k3, latent_dim, hidden),
        "dec_fc2": init_linear(k4, hidden, input_dim),
    }

    prepped = jax.tree_util.tree_map(jax.block_until_ready, prepare_params(params))

    out = jax.block_until_ready(dist_autoencoder_forward(x, prepped))
    ref = reference_forward(x, params)

    assert out.shape == (batch, input_dim)
    max_err = float(jnp.max(jnp.abs(out - ref)))
    # bf16 MXU operands with f32 accumulation -> ~1e-2 relative error budget.
    assert jnp.allclose(out, ref, atol=5e-2, rtol=5e-2), \
        f"mismatch vs pure-JAX f32 reference (max abs err {max_err:.4g})"

    # TODO(synk): the RPC/RRef distribution and _parameter_rrefs plumbing is
    # orchestration only and has no Pallas equivalent; the math is fully fused here.
    print("KERNEL_OK")
</pallas_src>

<mosaic_0001>
module attributes {stable_mosaic.version = 11 : i64} {
  func.func @autoencoder_kernel(%arg0: i32, %arg1: memref<16x64xf32, #tpu.memory_space<vmem>>, %arg2: memref<64x128xbf16, #tpu.memory_space<vmem>>, %arg3: memref<1x128xf32, #tpu.memory_space<vmem>>, %arg4: memref<128x128xbf16, #tpu.memory_space<vmem>>, %arg5: memref<1x128xf32, #tpu.memory_space<vmem>>, %arg6: memref<128x64xbf16, #tpu.memory_space<vmem>>, %arg7: memref<1x64xf32, #tpu.memory_space<vmem>>, %arg8: memref<16x64xf32, #tpu.memory_space<vmem>>) attributes {dimension_semantics = [#tpu.dimension_semantics<parallel>], iteration_bounds = array<i64: 1>, scalar_prefetch = 0 : i64, scratch_operands = 0 : i64, tpu.core_type = #tpu.core_type<tc>, window_params = [{transform_indices = @transform_0, window_bounds = array<i64: 16, 64>}, {pipeline_mode = #tpu.pipeline_mode<synchronous>, transform_indices = @transform_1, window_bounds = array<i64: 64, 128>}, {pipeline_mode = #tpu.pipeline_mode<synchronous>, transform_indices = @transform_2, window_bounds = array<i64: 1, 128>}, {pipeline_mode = #tpu.pipeline_mode<synchronous>, transform_indices = @transform_3, window_bounds = array<i64: 128, 128>}, {pipeline_mode = #tpu.pipeline_mode<synchronous>, transform_indices = @transform_4, window_bounds = array<i64: 1, 128>}, {pipeline_mode = #tpu.pipeline_mode<synchronous>, transform_indices = @transform_5, window_bounds = array<i64: 128, 64>}, {pipeline_mode = #tpu.pipeline_mode<synchronous>, transform_indices = @transform_6, window_bounds = array<i64: 1, 64>}, {transform_indices = @transform_7, window_bounds = array<i64: 16, 64>}]} {
    %c0 = arith.constant 0 : index
    %c0_0 = arith.constant 0 : index
    %0 = vector.load %arg1[%c0, %c0_0] : memref<16x64xf32, #tpu.memory_space<vmem>>, vector<16x64xf32>
    %1 = arith.truncf %0 : vector<16x64xf32> to vector<16x64xbf16>
    %c0_1 = arith.constant 0 : index
    %c0_2 = arith.constant 0 : index
    %2 = vector.load %arg2[%c0_1, %c0_2] : memref<64x128xbf16, #tpu.memory_space<vmem>>, vector<64x128xbf16>
    %cst = arith.constant dense<0.000000e+00> : vector<16x128xf32>
    %3 = tpu.matmul %1, %2, %cst {dimension_numbers = #tpu.dot_dimension_numbers<[1], [0], [0], [1], [0, 0, 1, 1], [], []>} : vector<16x64xbf16>, vector<64x128xbf16>, vector<16x128xf32> -> vector<16x128xf32>
    %c0_3 = arith.constant 0 : index
    %c0_4 = arith.constant 0 : index
    %4 = vector.load %arg3[%c0_3, %c0_4] : memref<1x128xf32, #tpu.memory_space<vmem>>, vector<1x128xf32>
    %5 = vector.broadcast %4 : vector<1x128xf32> to vector<16x128xf32>
    %6 = arith.addf %3, %5 : vector<16x128xf32>
    %cst_5 = arith.constant 0.000000e+00 : f32
    %7 = vector.broadcast %cst_5 : f32 to vector<16x128xf32>
    %8 = arith.maximumf %6, %7 : vector<16x128xf32>
    %9 = arith.truncf %8 : vector<16x128xf32> to vector<16x128xbf16>
    %c0_6 = arith.constant 0 : index
    %c0_7 = arith.constant 0 : index
    %10 = vector.load %arg4[%c0_6, %c0_7] : memref<128x128xbf16, #tpu.memory_space<vmem>>, vector<128x128xbf16>
    %cst_8 = arith.constant dense<0.000000e+00> : vector<16x128xf32>
    %11 = tpu.matmul %9, %10, %cst_8 {dimension_numbers = #tpu.dot_dimension_numbers<[1], [0], [0], [1], [0, 0, 1, 1], [], []>} : vector<16x128xbf16>, vector<128x128xbf16>, vector<16x128xf32> -> vector<16x128xf32>
    %c0_9 = arith.constant 0 : index
    %c0_10 = arith.constant 0 : index
    %12 = vector.load %arg5[%c0_9, %c0_10] : memref<1x128xf32, #tpu.memory_space<vmem>>, vector<1x128xf32>
    %13 = vector.broadcast %12 : vector<1x128xf32> to vector<16x128xf32>
    %14 = arith.addf %11, %13 : vector<16x128xf32>
    %cst_11 = arith.constant 0.000000e+00 : f32
    %15 = vector.broadcast %cst_11 : f32 to vector<16x128xf32>
    %16 = arith.maximumf %14, %15 : vector<16x128xf32>
    %17 = arith.truncf %16 : vector<16x128xf32> to vector<16x128xbf16>
    %c0_12 = arith.constant 0 : index
    %c0_13 = arith.constant 0 : index
    %18 = vector.load %arg6[%c0_12, %c0_13] : memref<128x64xbf16, #tpu.memory_space<vmem>>, vector<128x64xbf16>
    %cst_14 = arith.constant dense<0.000000e+00> : vector<16x64xf32>
    %19 = tpu.matmul %17, %18, %cst_14 {dimension_numbers = #tpu.dot_dimension_numbers<[1], [0], [0], [1], [0, 0, 1, 1], [], []>} : vector<16x128xbf16>, vector<128x64xbf16>, vector<16x64xf32> -> vector<16x64xf32>
    %c0_15 = arith.constant 0 : index
    %c0_16 = arith.constant 0 : index
    %20 = vector.load %arg7[%c0_15, %c0_16] : memref<1x64xf32, #tpu.memory_space<vmem>>, vector<1x64xf32>
    %21 = vector.broadcast %20 : vector<1x64xf32> to vector<16x64xf32>
    %22 = arith.addf %19, %21 : vector<16x64xf32>
    %c0_17 = arith.constant 0 : index
    %c0_18 = arith.constant 0 : index
    %23 = vector.load %arg8[%c0_17, %c0_18] : memref<16x64xf32, #tpu.memory_space<vmem>>, vector<16x64xf32>
    tpu.vector_store %arg8[%c0_17, %c0_18], %22 {strides = array<i32>} : memref<16x64xf32, #tpu.memory_space<vmem>>, vector<16x64xf32>,
    return
  }
  func.func @transform_0(%arg0: i32) -> (i32, i32) {
    %c0_i32 = arith.constant 0 : i32
    %c0_i32_0 = arith.constant 0 : i32
    return %arg0, %c0_i32 : i32, i32
  }
  func.func @transform_1(%arg0: i32) -> (i32, i32) {
    %c0_i32 = arith.constant 0 : i32
    %c0_i32_0 = arith.constant 0 : i32
    %c0_i32_1 = arith.constant 0 : i32
    return %c0_i32, %c0_i32_0 : i32, i32
  }
  func.func @transform_2(%arg0: i32) -> (i32, i32) {
    %c0_i32 = arith.constant 0 : i32
    %c0_i32_0 = arith.constant 0 : i32
    %c0_i32_1 = arith.constant 0 : i32
    return %c0_i32, %c0_i32_0 : i32, i32
  }
  func.func @transform_3(%arg0: i32) -> (i32, i32) {
    %c0_i32 = arith.constant 0 : i32
    %c0_i32_0 = arith.constant 0 : i32
    %c0_i32_1 = arith.constant 0 : i32
    return %c0_i32, %c0_i32_0 : i32, i32
  }
  func.func @transform_4(%arg0: i32) -> (i32, i32) {
    %c0_i32 = arith.constant 0 : i32
    %c0_i32_0 = arith.constant 0 : i32
    %c0_i32_1 = arith.constant 0 : i32
    return %c0_i32, %c0_i32_0 : i32, i32
  }
  func.func @transform_5(%arg0: i32) -> (i32, i32) {
    %c0_i32 = arith.constant 0 : i32
    %c0_i32_0 = arith.constant 0 : i32
    %c0_i32_1 = arith.constant 0 : i32
    return %c0_i32, %c0_i32_0 : i32, i32
  }
  func.func @transform_6(%arg0: i32) -> (i32, i32) {
    %c0_i32 = arith.constant 0 : i32
    %c0_i32_0 = arith.constant 0 : i32
    %c0_i32_1 = arith.constant 0 : i32
    return %c0_i32, %c0_i32_0 : i32, i32
  }
  func.func @transform_7(%arg0: i32) -> (i32, i32) {
    %c0_i32 = arith.constant 0 : i32
    %c0_i32_0 = arith.constant 0 : i32
    return %arg0, %c0_i32 : i32, i32
  }
}

</mosaic_0001>

<bundles_post_ra>
// kernel: tpu_custom_call.1
= control target key start
LH: loop header
LB: loop body
LE: loop exit
PB: predicated region body
PF: predicated region fallthrough
CT: control target
= control target key end

     0   :  { %12 = vsyncpa [#allocation3], 0  ;;  %s725_s0 = inlined_call_operand.hbm [shape: f32[16,64], index: 0, kind: input, shape index: {}]   ;;  %s726_s1 = inlined_call_operand.vmem [shape: bf16[64,128], index: 1, kind: input, shape index: {}]   ;;  %s727_s2 = inlined_call_operand.vmem [shape: f32[1,128], index: 2, kind: input, shape index: {}]   ;;  %s728_s3 = inlined_call_operand.vmem [shape: bf16[128,128], index: 3, kind: input, shape index: {}]   ;;  %s729_s4 = inlined_call_operand.vmem [shape: f32[1,128], index: 4, kind: input, shape index: {}]   ;;  %s730_s5 = inlined_call_operand.vmem [shape: bf16[128,64], index: 5, kind: input, shape index: {}]   ;;  %s731_s6 = inlined_call_operand.vmem [shape: f32[1,64], index: 6, kind: input, shape index: {}]   ;;  %s732_s7 = inlined_call_operand.hbm [shape: f32[16,64], index: 7, kind: output, shape index: {}]  }
   0x1   :  { %13 = vsyncpa [#allocation4], 0  ;;  %s551_s24 = smov [#allocation2]   ;;  %s503_s28 = scalar_lea.hbm %s725_s0, 256 }
   0x2   :  { %s19_s25 = sshll.u32 %s551_s24, 4  ;;  %p504_p0 = scmp.ne.s32.totalorder %s725_s0, %s503_s28  ;;  %s20_s25 = int_to_ptr.vmem [resolvable:$true] %s19_s25 }
   0x3   :  { %p507_p1 = scmp.lt.u32.totalorder %s503_s28, %s725_s0 }
   0x5   :  { %p509_p2 = pnand %p507_p1, %p504_p0 }
   0x7   :  { %512 = shalt.err (!%p509_p2)
}
   0x8   :  { %s513_s10 = scalar_lea.vmem %s20_s25, 256  ;;  %p518_p4 = scmp.lt.s32.totalorder %s20_s25, %s20_s25 }
   0x9   :  { %p514_p3 = scmp.ne.s32.totalorder %s20_s25, %s513_s10  ;;  %p519_p5 = scmp.lt.s32.totalorder %s513_s10, %s513_s10 }
   0xb   :  { %p520_p6 = por %p519_p5, %p518_p4 }
   0xd   :  { %p521_p7 = pnand %p520_p6, %p514_p3 }
   0xf   :  { %524 = shalt.err (!%p521_p7)
}
  0x10   :  { %s552_s11 = smov 128   ;;  %s553_s12 = smov 8  }
  0x11   :  { %25 = dma.hbm_to_vmem [thread:$0]  %s725_s0, 256, %s20_s25, [#allocation3], %s552_s11, %s552_s11, %s553_s12  }
  0x12   :  { %547 = dma.done.wait [#allocation3], 256  }
  0x13   :  { %548 = vsyncadd [#allocation3], 4294967040  ;;  %v554_v0 = vmov 0.0   ;;  %vm555_vm0 = vmmov 0   ;;  %v483_v1 = vld [vmem:[%s726_s1] sm:$0xff]   ;;  %v484_v2 = vld [vmem:[%s726_s1 + $0x8] sm:$0xff]  }
  0x14   :  { %425 = vmatprep.subr.bf16.mxu0 %v554_v0  ;;  %433 = vmatprep.mubr.msk.bf16.mxu0 %vm555_vm0, %v554_v0  ;;  %v487_v3 = vld [vmem:[%s728_s3] sm:$0xff]   ;;  %v485_v4 = vld [vmem:[%s726_s1 + $0x10] sm:$0xff]   ;;  %v488_v5 = vld [vmem:[%s728_s3 + $0x8] sm:$0xff]   ;;  %vm84_vm1 = vcmask 523264  }
  0x15   :  { %437 = vmatprep.subr.bf16.mxu1 %v554_v0  ;;  %453 = vmatprep.mubr.msk.bf16.mxu1 %vm555_vm0, %v554_v0  ;;  %v486_v6 = vld [vmem:[%s726_s1 + $0x18] sm:$0xff]   ;;  %v42_v7 = vld [vmem:[#allocation2] sm:$0xff]  ;;  %v43_v8 = vld [vmem:[#allocation2 + $0x8] sm:$0xff] }
  0x16   :  { %426 = vmatpush3.bf16.msra.mxu0 %v483_v1  ;;  %438 = vmatpush3.bf16.msra.mxu1 %v487_v3  ;;  %v489_v9 = vld [vmem:[%s728_s3 + $0x10] sm:$0xff]   ;;  %v44_v10 = vpack.c.bf16 %v43_v8, %v42_v7  ;;  %v490_v11 = vld [vmem:[%s728_s3 + $0x18] sm:$0xff]   ;;  %v491_v12 = vld [vmem:[%s728_s3 + $0x20] sm:$0xff]  }
  0x17   :  { %427 = vmatprep.subr.bf16.mxu0 %v554_v0  ;;  %439 = vmatprep.subr.bf16.mxu1 %v554_v0  ;;  %v492_v13 = vld [vmem:[%s728_s3 + $0x28] sm:$0xff]   ;;  %v493_v14 = vld [vmem:[%s728_s3 + $0x30] sm:$0xff]   ;;  %v494_v15 = vld [vmem:[%s728_s3 + $0x38] sm:$0xff]  }
  0x18   :  { %v495_v16 = vld [vmem:[%s730_s5] sm:$0xff]   ;;  %v496_v17 = vld [vmem:[%s730_s5 + $0x8] sm:$0xff]   ;;  %v497_v18 = vld [vmem:[%s730_s5 + $0x10] sm:$0xff]  }
  0x19   :  { %v498_v19 = vld [vmem:[%s730_s5 + $0x18] sm:$0xff]   ;;  %v499_v20 = vld [vmem:[%s730_s5 + $0x20] sm:$0xff]   ;;  %v500_v21 = vld [vmem:[%s730_s5 + $0x28] sm:$0xff]  }
  0x1a   :  { %428 = vmatpush3.bf16.msra.mxu0 %v484_v2  ;;  %440 = vmatpush3.bf16.msra.mxu1 %v488_v5  ;;  %v378_v22 = vld [vmem:[%s727_s2] ss:$0 sm:$0xff]  ;;  %v501_v32 = vld [vmem:[%s730_s5 + $0x30] sm:$0xff]   ;;  %v502_v33 = vld [vmem:[%s730_s5 + $0x38] sm:$0xff]   ;;  %s556_s5 = smov [#allocation5]  }
  0x1b   :  { %429 = vmatprep.subr.bf16.mxu0 %v554_v0  ;;  %441 = vmatprep.subr.bf16.mxu1 %v554_v0  ;;  %v384_v34 = vld [vmem:[%s729_s4] ss:$0 sm:$0xff]  ;;  %s366_s13 = sshll.u32 %s556_s5, 4  ;;  %s367_s13 = int_to_ptr.vmem [resolvable:$true] %s366_s13 }
  0x1c   :  { %v393_v44 = vld [vmem:[%s731_s6] ss:$0 sm:$0xff]  ;;  %s525_s4 = scalar_lea.vmem %s367_s13, 256  ;;  %p530_p9 = scmp.lt.s32.totalorder %s367_s13, %s367_s13 }
  0x1d   :  { %p526_p8 = scmp.ne.s32.totalorder %s367_s13, %s525_s4  ;;  %p531_p10 = scmp.lt.s32.totalorder %s525_s4, %s525_s4 }
  0x1e   :  { %430 = vmatpush3.bf16.msra.mxu0 %v485_v4  ;;  %442 = vmatpush3.bf16.msra.mxu1 %v489_v9 }
  0x1f   :  { %431 = vmatprep.subr.bf16.mxu0 %v554_v0  ;;  %443 = vmatprep.subr.bf16.mxu1 %v554_v0  ;;  %p532_p11 = por %p531_p10, %p530_p9 }
  0x21   :  { %p533_p12 = pnand %p532_p11, %p526_p8 }
  0x22   :  { %432 = vmatpush3.bf16.msra.mxu0 %v486_v6  ;;  %444 = vmatpush3.bf16.msra.mxu1 %v490_v11 }
  0x23   :  { %457 = vmatprep.subr.bf16.mxu0 %v554_v0  ;;  %445 = vmatprep.subr.bf16.mxu1 %v554_v0 }
  0x25   :  { %434 = vmatmul.mubr.msk.bf16.vlgmr.msra.gmra.mrb[0].mxu0 %vm84_vm1, %v44_v10 }
  0x26   :  { %473 = vmatprep.mubr.msk.bf16.mxu0 %vm555_vm0, %v554_v0  ;;  %446 = vmatpush3.bf16.msra.mxu1 %v491_v12 }
  0x27   :  { %447 = vmatprep.subr.bf16.mxu1 %v554_v0  ;;  %458 = vmatpush3.bf16.msra.mxu0 %v495_v16 }
  0x28   :  { %459 = vmatprep.subr.bf16.mxu0 %v554_v0 }
  0x2a   :  { %448 = vmatpush3.bf16.msra.mxu1 %v492_v13 }
  0x2b   :  { %449 = vmatprep.subr.bf16.mxu1 %v554_v0  ;;  %460 = vmatpush3.bf16.msra.mxu0 %v496_v17 }
  0x2c   :  { %461 = vmatprep.subr.bf16.mxu0 %v554_v0 }
  0x2e   :  { %450 = vmatpush3.bf16.msra.mxu1 %v493_v14 }
  0x2f   :  { %451 = vmatprep.subr.bf16.mxu1 %v554_v0  ;;  %462 = vmatpush3.bf16.msra.mxu0 %v497_v18 }
  0x30   :  { %463 = vmatprep.subr.bf16.mxu0 %v554_v0 }
  0x32   :  { %452 = vmatpush3.bf16.msra.mxu1 %v494_v15 }
  0x33   :  { %464 = vmatpush3.bf16.msra.mxu0 %v498_v19 }
  0x34   :  { %465 = vmatprep.subr.bf16.mxu0 %v554_v0 }
  0x37   :  { %466 = vmatpush3.bf16.msra.mxu0 %v499_v20 }
  0x38   :  { %467 = vmatprep.subr.bf16.mxu0 %v554_v0 }
  0x3b   :  { %468 = vmatpush3.bf16.msra.mxu0 %v500_v21 }
  0x3c   :  { %469 = vmatprep.subr.bf16.mxu0 %v554_v0 }
  0x3f   :  { %470 = vmatpush3.bf16.msra.mxu0 %v501_v32 }
  0x40   :  { %471 = vmatprep.subr.bf16.mxu0 %v554_v0 }
  0x43   :  { %472 = vmatpush3.bf16.msra.mxu0 %v502_v33 }
  0xf8   :  { %v122_v23 = vpop.f32.mrb[0].mxu0 }
  0xf9   :  { %v123_v24 = vadd.f32 %v378_v22, %v122_v23  ;;  %v435_v25 = vpop.f32.mrb[1].mxu0 }
  0xfa   :  { %v125_v26 = vpop.f32.mrb[2].mxu0 }
  0xfb   :  { %v126_v27 = vadd.f32 %v378_v22, %v125_v26  ;;  %v436_v28 = vpop.f32.mrb[3].mxu0  ;;  %v129_v29 = vmax.f32 %v123_v24, 0.0 }
  0xfd   :  { %v130_v30 = vmax.f32 %v126_v27, 0.0 }
  0xff   :  { %v131_v31 = vpack.c.bf16 %v130_v30, %v129_v29 }
 0x101   :  { %454 = vmatmul.mubr.bf16.vlgmr.msra.gmra.mrb[0].mxu1 %v131_v31 }
 0x1d4   :  { %v237_v35 = vpop.f32.mrb[0].mxu1 }
 0x1d5   :  { %v238_v36 = vadd.f32 %v384_v34, %v237_v35  ;;  %v455_v37 = vpop.f32.mrb[1].mxu1 }
 0x1d6   :  { %v240_v38 = vpop.f32.mrb[2].mxu1 }
 0x1d7   :  { %v241_v39 = vadd.f32 %v384_v34, %v240_v38  ;;  %v456_v40 = vpop.f32.mrb[3].mxu1  ;;  %v244_v41 = vmax.f32 %v238_v36, 0.0 }
 0x1d9   :  { %v245_v42 = vmax.f32 %v241_v39, 0.0 }
 0x1db   :  { %v246_v43 = vpack.c.bf16 %v245_v42, %v244_v41 }
 0x1dd   :  { %474 = vmatmul.mubr.bf16.vlgmr.msra.gmra.mrb[4].mxu0 %v246_v43 }
 0x2b0   :  { %v352_v45 = vpop.f32.mrb[4].mxu0 }
 0x2b1   :  { %v353_v46 = vadd.f32 %v393_v44, %v352_v45  ;;  %v475_v47 = vpop.f32.mrb[5].mxu0 }
 0x2b2   :  { %v355_v48 = vpop.f32.mrb[6].mxu0 }
 0x2b3   :  { %359 = vst.msk [vmem:[#allocation5] sm:$0xff] %vm84_vm1, %v353_v46  ;;  %v356_v49 = vadd.f32 %v393_v44, %v355_v48  ;;  %v476_v50 = vpop.f32.mrb[7].mxu0 }
 0x2b5   :  { %360 = vst.msk [vmem:[#allocation5 + $0x8] sm:$0xff] %vm84_vm1, %v356_v49 }
 0x2b6   :  { %536 = shalt.err (!%p533_p12)
}
 0x2b7   :  { %s537_s15 = scalar_lea.hbm %s732_s7, 256 }
 0x2b8   :  { %p538_p13 = scmp.ne.s32.totalorder %s732_s7, %s537_s15  ;;  %p541_p0 = scmp.lt.u32.totalorder %s537_s15, %s732_s7 }
 0x2ba   :  { %p543_p1 = pnand %p541_p0, %p538_p13 }
 0x2bc   :  { %546 = shalt.err (!%p543_p1)
}
 0x2bd   :  { %372 = dma.vmem_to_hbm [thread:$0]  %s367_s13, 256, %s732_s7, [#allocation4], %s552_s11, %s552_s11, %s553_s12  }
 0x2be   :  { %549 = dma.done.wait [#allocation4], 256  }
 0x2bf   :  { %550 = vsyncadd [#allocation4], 4294967040 }
 0x2c0   :  { %376 = vsyncpa [#allocation3], 1 }
 0x2c1   :  { %377 = vsyncpa [#allocation4], 1 }

</bundles_post_ra>
